<compile_context>
chip_gen: v5e
topology: v5e:2x2
jax: 0.10.0
libtpu: 0.0.40
codegen_flags: <defaults>
</compile_context>

<pallas_src>
import functools

import jax
import jax.numpy as jnp
import numpy as np
from jax import lax
from jax.experimental import pallas as pl
from jax.experimental.pallas import tpu as pltpu


def _round_up(x, m):
    return ((x + m - 1) // m) * m


def receiver_trainer_kernel(xp_ref, whh_ref, wout_ref, bout_ref, tgt_ref, dist_ref,
                            stats_ref, hr_ref, hrnn_ref,
                            *, batch_size, mm_dtype, unroll):
    S, TB, Hp = xp_ref.shape
    D = dist_ref.shape[0]

    # Hoisted once: recurrence weight (optionally bf16 for the MXU).
    whh = whh_ref[...].astype(mm_dtype)

    # ---- receiver: tanh RNN (input projection + bias already folded in) ----
    def step(t, h):
        pre = xp_ref[t] + jnp.dot(h.astype(mm_dtype), whh,
                                  preferred_element_type=jnp.float32)
        return jnp.tanh(pre)

    h_rnn = lax.fori_loop(0, S, step, jnp.zeros((TB, Hp), jnp.float32),
                          unroll=unroll)                               # (TB, Hp)

    h_r = jnp.dot(h_rnn.astype(mm_dtype), wout_ref[...].astype(mm_dtype),
                  preferred_element_type=jnp.float32) + bout_ref[...]  # (TB, Fp)

    hrnn_ref[...] = h_rnn
    hr_ref[...] = h_r

    # ---- trainer: target / distractor scores, streamed over D ---------------
    ts = jnp.sum(tgt_ref[...] * h_r, axis=-1, keepdims=True)           # (TB, 1)

    def d_score(d):
        return jnp.sum(dist_ref[d] * h_r, axis=-1, keepdims=True)      # (TB, 1)

    ds0 = d_score(0)
    loss_row = jnp.maximum(0.0, 1.0 - ts + ds0)
    max_d = ds0
    for d in range(1, D):
        dsd = d_score(d)
        loss_row = loss_row + jnp.maximum(0.0, 1.0 - ts + dsd)
        max_d = jnp.maximum(max_d, dsd)

    # torch.max returns the first index on ties -> target wins with >=
    acc_row = (ts >= max_d).astype(jnp.float32)                        # (TB, 1)

    # Mask batch-padding rows out of the reductions.
    row = pl.program_id(0) * TB + lax.broadcasted_iota(jnp.int32, (TB, 1), 0)
    valid = (row < batch_size).astype(jnp.float32)

    stats_ref[0, 0] = jnp.sum(loss_row * valid)
    stats_ref[0, 1] = jnp.sum(acc_row * valid)


def receiver_trainer_forward(messages, target, distractors, params,
                             use_bf16_matmul=False):
    """messages: (B,S) int32; target: (B,F) f32; distractors: (D,B,F) f32."""
    emb_table, w_ih, w_hh, b_h, w_out, b_out = params
    B, S = messages.shape
    H = w_hh.shape[0]
    F = w_out.shape[1]
    D = distractors.shape[0]
    assert D >= 1

    # Lane/sublane-aligned padded sizes.
    Hp = _round_up(H, 128)
    Fp = _round_up(F, 128)
    TB = min(_round_up(B, 8), 128)          # batch tile (sublane multiple)
    Bp = _round_up(B, TB)
    nb = Bp // TB

    f32 = jnp.float32
    # Zero-padding keeps the math exact: padded hidden units stay 0 through
    # tanh, padded output features stay 0, padded batch rows are masked.
    w_ih_p = jnp.zeros((w_ih.shape[0], Hp), f32).at[:, :H].set(w_ih)
    b_h_p = jnp.zeros((1, Hp), f32).at[:, :H].set(b_h)
    w_hh_p = jnp.zeros((Hp, Hp), f32).at[:H, :H].set(w_hh)
    w_out_p = jnp.zeros((Hp, Fp), f32).at[:H, :F].set(w_out)
    b_out_p = jnp.zeros((1, Fp), f32).at[:, :F].set(b_out)

    # Fuse embedding + input projection + hidden bias: one tiny (V,E)x(E,Hp)
    # matmul, then a token-id gather (XLA glue) -> time-major (S, Bp, Hp).
    # TODO(synk): the gather itself stays in XLA; an in-kernel DMA gather of P
    # rows would also remove the x_proj HBM round trip.
    proj_table = emb_table @ w_ih_p + b_h_p                       # (V, Hp)
    x_proj = jnp.take(proj_table, messages, axis=0)               # (B, S, Hp)
    x_proj = jnp.transpose(x_proj, (1, 0, 2))                     # (S, B, Hp)
    x_proj = jnp.pad(x_proj, ((0, 0), (0, Bp - B), (0, 0)))

    tgt_p = jnp.pad(target, ((0, Bp - B), (0, Fp - F)))            # (Bp, Fp)
    dist_p = jnp.pad(distractors, ((0, 0), (0, Bp - B), (0, Fp - F)))  # (D,Bp,Fp)

    mm_dtype = jnp.bfloat16 if use_bf16_matmul else jnp.float32
    unroll = True if S <= 8 else 4

    # Explicit VMEM budget (double-buffered blocks + headroom), capped well
    # under v7x's 64 MiB physical VMEM.
    blk_in = 4 * (S * TB * Hp + Hp * Hp + Hp * Fp + Fp + TB * Fp + D * TB * Fp)
    blk_out = 4 * (TB * Fp + TB * Hp + 2)
    vmem_limit = int(min(48 * 2**20, max(16 * 2**20, 3 * (blk_in + blk_out))))

    out_shapes = (
        jax.ShapeDtypeStruct((nb, 2), jnp.float32),    # per-tile [loss_sum, acc_sum]
        jax.ShapeDtypeStruct((Bp, Fp), jnp.float32),   # h_r (padded)
        jax.ShapeDtypeStruct((Bp, Hp), jnp.float32),   # h_rnn (padded)
    )

    grid_spec = pl.GridSpec(
        grid=(nb,),
        in_specs=[
            pl.BlockSpec((S, TB, Hp), lambda i: (0, i, 0)),        # x_proj
            pl.BlockSpec((Hp, Hp), lambda i: (0, 0)),              # w_hh
            pl.BlockSpec((Hp, Fp), lambda i: (0, 0)),              # w_out
            pl.BlockSpec((1, Fp), lambda i: (0, 0)),               # b_out
            pl.BlockSpec((TB, Fp), lambda i: (i, 0)),              # target
            pl.BlockSpec((D, TB, Fp), lambda i: (0, i, 0)),        # distractors
        ],
        out_specs=[
            pl.BlockSpec((1, 2), lambda i: (i, 0),
                         memory_space=pltpu.MemorySpace.SMEM),     # scalar stats
            pl.BlockSpec((TB, Fp), lambda i: (i, 0)),              # h_r
            pl.BlockSpec((TB, Hp), lambda i: (i, 0)),              # h_rnn
        ],
    )

    stats, h_r_p, h_rnn_p = pl.pallas_call(
        functools.partial(receiver_trainer_kernel, batch_size=B,
                          mm_dtype=mm_dtype, unroll=unroll),
        out_shape=out_shapes,
        grid_spec=grid_spec,
        compiler_params=pltpu.CompilerParams(
            dimension_semantics=("parallel",),
            vmem_limit_bytes=vmem_limit),
    )(x_proj, w_hh_p, w_out_p, b_out_p, tgt_p, dist_p)

    mean_loss = jnp.sum(stats[:, 0]) / B
    mean_acc = jnp.sum(stats[:, 1]) / B
    h_r = h_r_p[:B, :F]
    h_rnn = h_rnn_p[:B, :H]

    # training-mode return of the PyTorch module: (mean loss, mean acc, messages)
    # (+ h_r / h_rnn, which the eval branch of the module also exposes)
    return mean_loss, mean_acc, messages, h_r, h_rnn


def reference_forward(messages, target, distractors, params):
    emb_table, w_ih, w_hh, b_h, w_out, b_out = params
    B, S = messages.shape
    x = jnp.take(emb_table, messages, axis=0)            # (B,S,E)
    h = jnp.zeros((B, w_hh.shape[0]), jnp.float32)
    for t in range(S):
        h = jnp.tanh(x[:, t] @ w_ih + h @ w_hh + b_h)
    h_r = h @ w_out + b_out
    ts = jnp.sum(target * h_r, axis=-1)                  # (B,)
    ds = jnp.sum(distractors * h_r[None], axis=-1)       # (D,B)
    loss = jnp.mean(jnp.sum(jnp.maximum(0.0, 1.0 - ts[None] + ds), axis=0))
    acc = jnp.mean((ts >= jnp.max(ds, axis=0)).astype(jnp.float32))
    return loss, acc, h_r, h


if __name__ == "__main__":
    B, S, V, E, H, F, D = 8, 6, 10, 32, 32, 32, 3

    key = jax.random.PRNGKey(0)
    keys = jax.random.split(key, 10)
    emb_table = 0.1 * jax.random.normal(keys[0], (V, E), jnp.float32)
    w_ih = 0.1 * jax.random.normal(keys[1], (E, H), jnp.float32)
    w_hh = 0.1 * jax.random.normal(keys[2], (H, H), jnp.float32)
    b_h = 0.1 * jax.random.normal(keys[3], (1, H), jnp.float32)
    w_out = 0.1 * jax.random.normal(keys[4], (H, F), jnp.float32)
    b_out = 0.1 * jax.random.normal(keys[5], (1, F), jnp.float32)
    params = (emb_table, w_ih, w_hh, b_h, w_out, b_out)

    messages = jax.random.randint(keys[6], (B, S), 0, V, dtype=jnp.int32)
    target = jax.random.normal(keys[7], (B, F), jnp.float32)
    distractors = jax.random.normal(keys[8], (D, B, F), jnp.float32)

    fwd = jax.jit(receiver_trainer_forward)
    loss, acc, msgs, h_r, h_rnn = jax.block_until_ready(
        fwd(messages, target, distractors, params))

    ref_loss, ref_acc, ref_hr, ref_hrnn = reference_forward(
        messages, target, distractors, params)

    np.testing.assert_allclose(np.asarray(loss), np.asarray(ref_loss), rtol=1e-4, atol=1e-4)
    np.testing.assert_allclose(np.asarray(acc), np.asarray(ref_acc), rtol=1e-4, atol=1e-4)
    np.testing.assert_allclose(np.asarray(h_r), np.asarray(ref_hr), rtol=1e-4, atol=1e-4)
    np.testing.assert_allclose(np.asarray(h_rnn), np.asarray(ref_hrnn), rtol=1e-4, atol=1e-4)

    print("KERNEL_OK")
</pallas_src>

<mosaic_0001>
module attributes {stable_mosaic.version = 11 : i64} {
  func.func @receiver_trainer_kernel(%arg0: i32, %arg1: memref<6x8x128xf32, #tpu.memory_space<vmem>>, %arg2: memref<128x128xf32, #tpu.memory_space<vmem>>, %arg3: memref<128x128xf32, #tpu.memory_space<vmem>>, %arg4: memref<1x128xf32, #tpu.memory_space<vmem>>, %arg5: memref<8x128xf32, #tpu.memory_space<vmem>>, %arg6: memref<3x8x128xf32, #tpu.memory_space<vmem>>, %arg7: memref<1x2xf32, #tpu.memory_space<smem>>, %arg8: memref<8x128xf32, #tpu.memory_space<vmem>>, %arg9: memref<8x128xf32, #tpu.memory_space<vmem>>) attributes {dimension_semantics = [#tpu.dimension_semantics<parallel>], iteration_bounds = array<i64: 1>, scalar_prefetch = 0 : i64, scratch_operands = 0 : i64, tpu.core_type = #tpu.core_type<tc>, window_params = [{transform_indices = @transform_0, window_bounds = array<i64: 6, 8, 128>}, {pipeline_mode = #tpu.pipeline_mode<synchronous>, transform_indices = @transform_1, window_bounds = array<i64: 128, 128>}, {pipeline_mode = #tpu.pipeline_mode<synchronous>, transform_indices = @transform_2, window_bounds = array<i64: 128, 128>}, {pipeline_mode = #tpu.pipeline_mode<synchronous>, transform_indices = @transform_3, window_bounds = array<i64: 1, 128>}, {transform_indices = @transform_4, window_bounds = array<i64: 8, 128>}, {transform_indices = @transform_5, window_bounds = array<i64: 3, 8, 128>}, {transform_indices = @transform_6, window_bounds = array<i64: 1, 2>}, {transform_indices = @transform_7, window_bounds = array<i64: 8, 128>}, {transform_indices = @transform_8, window_bounds = array<i64: 8, 128>}]} {
    %c0 = arith.constant 0 : index
    %c0_0 = arith.constant 0 : index
    %0 = vector.load %arg2[%c0, %c0_0] : memref<128x128xf32, #tpu.memory_space<vmem>>, vector<128x128xf32>
    %cst = arith.constant 0.000000e+00 : f32
    %1 = vector.broadcast %cst : f32 to vector<8x128xf32>
    %c0_i32 = arith.constant 0 : i32
    %2 = arith.index_cast %c0_i32 : i32 to index
    %c0_1 = arith.constant 0 : index
    %c0_2 = arith.constant 0 : index
    %3 = vector.load %arg1[%2, %c0_1, %c0_2] : memref<6x8x128xf32, #tpu.memory_space<vmem>>, vector<1x8x128xf32>
    %4 = vector.shape_cast %3 : vector<1x8x128xf32> to vector<8x128xf32>
    %cst_3 = arith.constant dense<0.000000e+00> : vector<8x128xf32>
    %5 = tpu.matmul %1, %0, %cst_3 {dimension_numbers = #tpu.dot_dimension_numbers<[1], [0], [0], [1], [0, 0, 1, 1], [], []>} : vector<8x128xf32>, vector<128x128xf32>, vector<8x128xf32> -> vector<8x128xf32>
    %6 = arith.addf %4, %5 : vector<8x128xf32>
    %7 = math.tanh %6 : vector<8x128xf32>
    %c1_i32 = arith.constant 1 : i32
    %8 = arith.index_cast %c1_i32 : i32 to index
    %c0_4 = arith.constant 0 : index
    %c0_5 = arith.constant 0 : index
    %9 = vector.load %arg1[%8, %c0_4, %c0_5] : memref<6x8x128xf32, #tpu.memory_space<vmem>>, vector<1x8x128xf32>
    %10 = vector.shape_cast %9 : vector<1x8x128xf32> to vector<8x128xf32>
    %cst_6 = arith.constant dense<0.000000e+00> : vector<8x128xf32>
    %11 = tpu.matmul %7, %0, %cst_6 {dimension_numbers = #tpu.dot_dimension_numbers<[1], [0], [0], [1], [0, 0, 1, 1], [], []>} : vector<8x128xf32>, vector<128x128xf32>, vector<8x128xf32> -> vector<8x128xf32>
    %12 = arith.addf %10, %11 : vector<8x128xf32>
    %13 = math.tanh %12 : vector<8x128xf32>
    %c2_i32 = arith.constant 2 : i32
    %14 = arith.index_cast %c2_i32 : i32 to index
    %c0_7 = arith.constant 0 : index
    %c0_8 = arith.constant 0 : index
    %15 = vector.load %arg1[%14, %c0_7, %c0_8] : memref<6x8x128xf32, #tpu.memory_space<vmem>>, vector<1x8x128xf32>
    %16 = vector.shape_cast %15 : vector<1x8x128xf32> to vector<8x128xf32>
    %cst_9 = arith.constant dense<0.000000e+00> : vector<8x128xf32>
    %17 = tpu.matmul %13, %0, %cst_9 {dimension_numbers = #tpu.dot_dimension_numbers<[1], [0], [0], [1], [0, 0, 1, 1], [], []>} : vector<8x128xf32>, vector<128x128xf32>, vector<8x128xf32> -> vector<8x128xf32>
    %18 = arith.addf %16, %17 : vector<8x128xf32>
    %19 = math.tanh %18 : vector<8x128xf32>
    %c3_i32 = arith.constant 3 : i32
    %20 = arith.index_cast %c3_i32 : i32 to index
    %c0_10 = arith.constant 0 : index
    %c0_11 = arith.constant 0 : index
    %21 = vector.load %arg1[%20, %c0_10, %c0_11] : memref<6x8x128xf32, #tpu.memory_space<vmem>>, vector<1x8x128xf32>
    %22 = vector.shape_cast %21 : vector<1x8x128xf32> to vector<8x128xf32>
    %cst_12 = arith.constant dense<0.000000e+00> : vector<8x128xf32>
    %23 = tpu.matmul %19, %0, %cst_12 {dimension_numbers = #tpu.dot_dimension_numbers<[1], [0], [0], [1], [0, 0, 1, 1], [], []>} : vector<8x128xf32>, vector<128x128xf32>, vector<8x128xf32> -> vector<8x128xf32>
    %24 = arith.addf %22, %23 : vector<8x128xf32>
    %25 = math.tanh %24 : vector<8x128xf32>
    %c4_i32 = arith.constant 4 : i32
    %26 = arith.index_cast %c4_i32 : i32 to index
    %c0_13 = arith.constant 0 : index
    %c0_14 = arith.constant 0 : index
    %27 = vector.load %arg1[%26, %c0_13, %c0_14] : memref<6x8x128xf32, #tpu.memory_space<vmem>>, vector<1x8x128xf32>
    %28 = vector.shape_cast %27 : vector<1x8x128xf32> to vector<8x128xf32>
    %cst_15 = arith.constant dense<0.000000e+00> : vector<8x128xf32>
    %29 = tpu.matmul %25, %0, %cst_15 {dimension_numbers = #tpu.dot_dimension_numbers<[1], [0], [0], [1], [0, 0, 1, 1], [], []>} : vector<8x128xf32>, vector<128x128xf32>, vector<8x128xf32> -> vector<8x128xf32>
    %30 = arith.addf %28, %29 : vector<8x128xf32>
    %31 = math.tanh %30 : vector<8x128xf32>
    %c5_i32 = arith.constant 5 : i32
    %32 = arith.index_cast %c5_i32 : i32 to index
    %c0_16 = arith.constant 0 : index
    %c0_17 = arith.constant 0 : index
    %33 = vector.load %arg1[%32, %c0_16, %c0_17] : memref<6x8x128xf32, #tpu.memory_space<vmem>>, vector<1x8x128xf32>
    %34 = vector.shape_cast %33 : vector<1x8x128xf32> to vector<8x128xf32>
    %cst_18 = arith.constant dense<0.000000e+00> : vector<8x128xf32>
    %35 = tpu.matmul %31, %0, %cst_18 {dimension_numbers = #tpu.dot_dimension_numbers<[1], [0], [0], [1], [0, 0, 1, 1], [], []>} : vector<8x128xf32>, vector<128x128xf32>, vector<8x128xf32> -> vector<8x128xf32>
    %36 = arith.addf %34, %35 : vector<8x128xf32>
    %37 = math.tanh %36 : vector<8x128xf32>
    %c6_i32 = arith.constant 6 : i32
    %c0_19 = arith.constant 0 : index
    %c0_20 = arith.constant 0 : index
    %38 = vector.load %arg3[%c0_19, %c0_20] : memref<128x128xf32, #tpu.memory_space<vmem>>, vector<128x128xf32>
    %cst_21 = arith.constant dense<0.000000e+00> : vector<8x128xf32>
    %39 = tpu.matmul %37, %38, %cst_21 {dimension_numbers = #tpu.dot_dimension_numbers<[1], [0], [0], [1], [0, 0, 1, 1], [], []>} : vector<8x128xf32>, vector<128x128xf32>, vector<8x128xf32> -> vector<8x128xf32>
    %c0_22 = arith.constant 0 : index
    %c0_23 = arith.constant 0 : index
    %40 = vector.load %arg4[%c0_22, %c0_23] : memref<1x128xf32, #tpu.memory_space<vmem>>, vector<1x128xf32>
    %41 = vector.broadcast %40 : vector<1x128xf32> to vector<8x128xf32>
    %42 = arith.addf %39, %41 : vector<8x128xf32>
    %c0_24 = arith.constant 0 : index
    %c0_25 = arith.constant 0 : index
    %43 = vector.load %arg9[%c0_24, %c0_25] : memref<8x128xf32, #tpu.memory_space<vmem>>, vector<8x128xf32>
    tpu.vector_store %arg9[%c0_24, %c0_25], %37 {strides = array<i32>} : memref<8x128xf32, #tpu.memory_space<vmem>>, vector<8x128xf32>,
    %c0_26 = arith.constant 0 : index
    %c0_27 = arith.constant 0 : index
    %44 = vector.load %arg8[%c0_26, %c0_27] : memref<8x128xf32, #tpu.memory_space<vmem>>, vector<8x128xf32>
    tpu.vector_store %arg8[%c0_26, %c0_27], %42 {strides = array<i32>} : memref<8x128xf32, #tpu.memory_space<vmem>>, vector<8x128xf32>,
    %c0_28 = arith.constant 0 : index
    %c0_29 = arith.constant 0 : index
    %45 = vector.load %arg5[%c0_28, %c0_29] : memref<8x128xf32, #tpu.memory_space<vmem>>, vector<8x128xf32>
    %46 = arith.mulf %45, %42 : vector<8x128xf32>
    %cst_30 = arith.constant dense<0.000000e+00> : vector<8xf32>
    %47 = vector.multi_reduction <add>, %46, %cst_30 [1] : vector<8x128xf32> to vector<8xf32>
    %48 = vector.shape_cast %47 : vector<8xf32> to vector<8x1xf32>
    %c0_31 = arith.constant 0 : index
    %c0_32 = arith.constant 0 : index
    %c0_33 = arith.constant 0 : index
    %49 = vector.load %arg6[%c0_31, %c0_32, %c0_33] : memref<3x8x128xf32, #tpu.memory_space<vmem>>, vector<1x8x128xf32>
    %50 = vector.shape_cast %49 : vector<1x8x128xf32> to vector<8x128xf32>
    %51 = arith.mulf %50, %42 : vector<8x128xf32>
    %cst_34 = arith.constant dense<0.000000e+00> : vector<8xf32>
    %52 = vector.multi_reduction <add>, %51, %cst_34 [1] : vector<8x128xf32> to vector<8xf32>
    %53 = vector.shape_cast %52 : vector<8xf32> to vector<8x1xf32>
    %cst_35 = arith.constant 1.000000e+00 : f32
    %54 = vector.broadcast %cst_35 : f32 to vector<8x1xf32>
    %55 = arith.subf %54, %48 : vector<8x1xf32>
    %56 = arith.addf %55, %53 : vector<8x1xf32>
    %cst_36 = arith.constant 0.000000e+00 : f32
    %57 = vector.broadcast %cst_36 : f32 to vector<8x1xf32>
    %58 = arith.maximumf %57, %56 : vector<8x1xf32>
    %c1 = arith.constant 1 : index
    %c0_37 = arith.constant 0 : index
    %c0_38 = arith.constant 0 : index
    %59 = vector.load %arg6[%c1, %c0_37, %c0_38] : memref<3x8x128xf32, #tpu.memory_space<vmem>>, vector<1x8x128xf32>
    %60 = vector.shape_cast %59 : vector<1x8x128xf32> to vector<8x128xf32>
    %61 = arith.mulf %60, %42 : vector<8x128xf32>
    %cst_39 = arith.constant dense<0.000000e+00> : vector<8xf32>
    %62 = vector.multi_reduction <add>, %61, %cst_39 [1] : vector<8x128xf32> to vector<8xf32>
    %63 = vector.shape_cast %62 : vector<8xf32> to vector<8x1xf32>
    %cst_40 = arith.constant 1.000000e+00 : f32
    %64 = vector.broadcast %cst_40 : f32 to vector<8x1xf32>
    %65 = arith.subf %64, %48 : vector<8x1xf32>
    %66 = arith.addf %65, %63 : vector<8x1xf32>
    %cst_41 = arith.constant 0.000000e+00 : f32
    %67 = vector.broadcast %cst_41 : f32 to vector<8x1xf32>
    %68 = arith.maximumf %67, %66 : vector<8x1xf32>
    %69 = arith.addf %58, %68 : vector<8x1xf32>
    %70 = arith.maximumf %53, %63 : vector<8x1xf32>
    %c2 = arith.constant 2 : index
    %c0_42 = arith.constant 0 : index
    %c0_43 = arith.constant 0 : index
    %71 = vector.load %arg6[%c2, %c0_42, %c0_43] : memref<3x8x128xf32, #tpu.memory_space<vmem>>, vector<1x8x128xf32>
    %72 = vector.shape_cast %71 : vector<1x8x128xf32> to vector<8x128xf32>
    %73 = arith.mulf %72, %42 : vector<8x128xf32>
    %cst_44 = arith.constant dense<0.000000e+00> : vector<8xf32>
    %74 = vector.multi_reduction <add>, %73, %cst_44 [1] : vector<8x128xf32> to vector<8xf32>
    %75 = vector.shape_cast %74 : vector<8xf32> to vector<8x1xf32>
    %cst_45 = arith.constant 1.000000e+00 : f32
    %76 = vector.broadcast %cst_45 : f32 to vector<8x1xf32>
    %77 = arith.subf %76, %48 : vector<8x1xf32>
    %78 = arith.addf %77, %75 : vector<8x1xf32>
    %cst_46 = arith.constant 0.000000e+00 : f32
    %79 = vector.broadcast %cst_46 : f32 to vector<8x1xf32>
    %80 = arith.maximumf %79, %78 : vector<8x1xf32>
    %81 = arith.addf %69, %80 : vector<8x1xf32>
    %82 = arith.maximumf %70, %75 : vector<8x1xf32>
    %83 = arith.cmpf oge, %48, %82 : vector<8x1xf32>
    %84 = arith.extui %83 : vector<8x1xi1> to vector<8x1xi32>
    %85 = arith.sitofp %84 : vector<8x1xi32> to vector<8x1xf32>
    %c8_i32 = arith.constant 8 : i32
    %86 = arith.muli %arg0, %c8_i32 : i32
    %87 = tpu.iota {dimensions = array<i32: 0>} : vector<8x1xi32>
    %88 = vector.broadcast %86 : i32 to vector<8x1xi32>
    %89 = arith.addi %88, %87 : vector<8x1xi32>
    %c8_i32_47 = arith.constant 8 : i32
    %90 = vector.broadcast %c8_i32_47 : i32 to vector<8x1xi32>
    %91 = arith.cmpi slt, %89, %90 : vector<8x1xi32>
    %92 = arith.extui %91 : vector<8x1xi1> to vector<8x1xi32>
    %93 = arith.sitofp %92 : vector<8x1xi32> to vector<8x1xf32>
    %94 = arith.mulf %81, %93 : vector<8x1xf32>
    %95 = vector.shape_cast %94 : vector<8x1xf32> to vector<1x8x1xf32>
    %cst_48 = arith.constant dense<0.000000e+00> : vector<1xf32>
    %96 = vector.multi_reduction <add>, %95, %cst_48 [1, 2] : vector<1x8x1xf32> to vector<1xf32>
    %97 = vector.shape_cast %96 : vector<1xf32> to vector<1x1x1xf32>
    %98 = vector.extract %97[0, 0, 0] : f32 from vector<1x1x1xf32>
    %c0_49 = arith.constant 0 : index
    %c0_50 = arith.constant 0 : index
    %99 = memref.load %arg7[%c0_49, %c0_50] : memref<1x2xf32, #tpu.memory_space<smem>>
    memref.store %98, %arg7[%c0_49, %c0_50] : memref<1x2xf32, #tpu.memory_space<smem>>
    %100 = arith.mulf %85, %93 : vector<8x1xf32>
    %101 = vector.shape_cast %100 : vector<8x1xf32> to vector<1x8x1xf32>
    %cst_51 = arith.constant dense<0.000000e+00> : vector<1xf32>
    %102 = vector.multi_reduction <add>, %101, %cst_51 [1, 2] : vector<1x8x1xf32> to vector<1xf32>
    %103 = vector.shape_cast %102 : vector<1xf32> to vector<1x1x1xf32>
    %104 = vector.extract %103[0, 0, 0] : f32 from vector<1x1x1xf32>
    %c0_52 = arith.constant 0 : index
    %c1_53 = arith.constant 1 : index
    %105 = memref.load %arg7[%c0_52, %c1_53] : memref<1x2xf32, #tpu.memory_space<smem>>
    memref.store %104, %arg7[%c0_52, %c1_53] : memref<1x2xf32, #tpu.memory_space<smem>>
    return
  }
  func.func @transform_0(%arg0: i32) -> (i32, i32, i32) {
    %c0_i32 = arith.constant 0 : i32
    %c0_i32_0 = arith.constant 0 : i32
    %c0_i32_1 = arith.constant 0 : i32
    return %c0_i32, %arg0, %c0_i32_0 : i32, i32, i32
  }
  func.func @transform_1(%arg0: i32) -> (i32, i32) {
    %c0_i32 = arith.constant 0 : i32
    %c0_i32_0 = arith.constant 0 : i32
    %c0_i32_1 = arith.constant 0 : i32
    return %c0_i32, %c0_i32_0 : i32, i32
  }
  func.func @transform_2(%arg0: i32) -> (i32, i32) {
    %c0_i32 = arith.constant 0 : i32
    %c0_i32_0 = arith.constant 0 : i32
    %c0_i32_1 = arith.constant 0 : i32
    return %c0_i32, %c0_i32_0 : i32, i32
  }
  func.func @transform_3(%arg0: i32) -> (i32, i32) {
    %c0_i32 = arith.constant 0 : i32
    %c0_i32_0 = arith.constant 0 : i32
    %c0_i32_1 = arith.constant 0 : i32
    return %c0_i32, %c0_i32_0 : i32, i32
  }
  func.func @transform_4(%arg0: i32) -> (i32, i32) {
    %c0_i32 = arith.constant 0 : i32
    %c0_i32_0 = arith.constant 0 : i32
    return %arg0, %c0_i32 : i32, i32
  }
  func.func @transform_5(%arg0: i32) -> (i32, i32, i32) {
    %c0_i32 = arith.constant 0 : i32
    %c0_i32_0 = arith.constant 0 : i32
    %c0_i32_1 = arith.constant 0 : i32
    return %c0_i32, %arg0, %c0_i32_0 : i32, i32, i32
  }
  func.func @transform_6(%arg0: i32) -> (i32, i32) {
    %c0_i32 = arith.constant 0 : i32
    %c0_i32_0 = arith.constant 0 : i32
    return %arg0, %c0_i32 : i32, i32
  }
  func.func @transform_7(%arg0: i32) -> (i32, i32) {
    %c0_i32 = arith.constant 0 : i32
    %c0_i32_0 = arith.constant 0 : i32
    return %arg0, %c0_i32 : i32, i32
  }
  func.func @transform_8(%arg0: i32) -> (i32, i32) {
    %c0_i32 = arith.constant 0 : i32
    %c0_i32_0 = arith.constant 0 : i32
    return %arg0, %c0_i32 : i32, i32
  }
}

</mosaic_0001>

<bundles_post_ra>
// kernel: receiver_trainer_forward.1
= control target key start
LH: loop header
LB: loop body
LE: loop exit
PB: predicated region body
PF: predicated region fallthrough
CT: control target
= control target key end

     0   :  { %14 = vsyncpa [#allocation4], 0  ;;  %s700_s0 = inlined_call_operand.vmem [shape: f32[6,8,128], index: 0, kind: input, shape index: {}]   ;;  %s701_s1 = inlined_call_operand.vmem [shape: f32[128,128], index: 1, kind: input, shape index: {}]   ;;  %s702_s2 = inlined_call_operand.vmem [shape: f32[128,128], index: 2, kind: input, shape index: {}]   ;;  %s703_s3 = inlined_call_operand.vmem [shape: f32[1,128], index: 3, kind: input, shape index: {}]   ;;  %s704_s4 = inlined_call_operand.vmem [shape: f32[8,128], index: 4, kind: input, shape index: {}]   ;;  %s705_s5 = inlined_call_operand.vmem [shape: f32[3,8,128], index: 5, kind: input, shape index: {}]   ;;  %s706_s6 = inlined_call_operand.vmem [shape: f32[1,2], index: 6, kind: output, shape index: {0}]   ;;  %s707_s7 = inlined_call_operand.hbm [shape: f32[8,128], index: 7, kind: output, shape index: {1}]   ;;  %s708_s8 = inlined_call_operand.hbm [shape: f32[8,128], index: 8, kind: output, shape index: {2}]  }
   0x1   :  { %15 = vsyncpa [#allocation3], 0  ;;  %v491_v0 = vld [vmem:[%s701_s1 + $0x78] sm:$0xff]  ;;  %v496_v1 = vld [vmem:[%s701_s1 + $0x70] sm:$0xff] }
   0x2   :  { %46 = vmatpush.msra.mxu0 %v491_v0  ;;  %70 = vmatpush.msra.mxu1 %v491_v0  ;;  %v503_v2 = vld [vmem:[%s701_s1 + $0x68] sm:$0xff]  ;;  %v512_v3 = vld [vmem:[%s701_s1 + $0x60] sm:$0xff]  ;;  %v521_v4 = vld [vmem:[%s701_s1 + $0x58] sm:$0xff] }
   0x3   :  { %94 = vmatpush.msra.mxu2 %v491_v0  ;;  %118 = vmatpush.msra.mxu3 %v491_v0 }
   0x4   :  { %47 = vmatpush.msra.mxu0 %v496_v1  ;;  %71 = vmatpush.msra.mxu1 %v496_v1 }
   0x5   :  { %95 = vmatpush.msra.mxu2 %v496_v1  ;;  %119 = vmatpush.msra.mxu3 %v496_v1 }
   0x6   :  { %48 = vmatpush.msra.mxu0 %v503_v2  ;;  %72 = vmatpush.msra.mxu1 %v503_v2 }
   0x7   :  { %96 = vmatpush.msra.mxu2 %v503_v2  ;;  %120 = vmatpush.msra.mxu3 %v503_v2 }
   0x8   :  { %16 = vsyncpa [#allocation7], 0  ;;  %49 = vmatpush.msra.mxu0 %v512_v3  ;;  %73 = vmatpush.msra.mxu1 %v512_v3  ;;  %v530_v5 = vld [vmem:[%s701_s1 + $0x50] sm:$0xff]  ;;  %v539_v6 = vld [vmem:[%s701_s1 + $0x48] sm:$0xff]  ;;  %v439_v16 = vmov 0.0   ;;  %vm271_vm0 = vcmask 7168  }
   0x9   :  { %97 = vmatpush.msra.mxu2 %v512_v3  ;;  %121 = vmatpush.msra.mxu3 %v512_v3  ;;  %v548_v7 = vld [vmem:[%s701_s1 + $0x40] sm:$0xff]  ;;  %v557_v8 = vld [vmem:[%s701_s1 + $0x38] sm:$0xff]  ;;  %v35_v9 = vld [vmem:[%s701_s1 + $0x30] sm:$0xff]  ;;  %s313_s21 = sshll.u32 %s707_s7, 4  ;;  %s441_s22 = smov [#allocation6]   ;;  %s314_s21 = int_to_ptr.hbm [resolvable:$true] %s313_s21 }
   0xa   :  { %50 = vmatpush.msra.mxu0 %v521_v4  ;;  %74 = vmatpush.msra.mxu1 %v521_v4  ;;  %v34_v10 = vld [vmem:[%s701_s1 + $0x28] sm:$0xff]  ;;  %v33_v11 = vld [vmem:[%s701_s1 + $0x20] sm:$0xff]  ;;  %v32_v12 = vld [vmem:[%s701_s1 + $0x18] sm:$0xff]  ;;  %s322_s23 = sshll.u32 %s441_s22, 4  ;;  %s324_s26 = sshll.u32 %s708_s8, 4  ;;  %s323_s23 = int_to_ptr.vmem [resolvable:$true] %s322_s23  ;;  %s325_s26 = int_to_ptr.hbm [resolvable:$true] %s324_s26 }
   0xb   :  { %98 = vmatpush.msra.mxu2 %v521_v4  ;;  %122 = vmatpush.msra.mxu3 %v521_v4  ;;  %v31_v13 = vld [vmem:[%s701_s1 + $0x10] sm:$0xff]  ;;  %v30_v14 = vld [vmem:[%s701_s1 + $0x8] sm:$0xff]  ;;  %v29_v15 = vld [vmem:[%s701_s1] sm:$0xff]  ;;  %s302_s28 = sshll.u32 %s706_s6, 4  ;;  %s442_s30 = smov [#allocation2]   ;;  %s303_s28 = int_to_ptr.vmem [resolvable:$true] %s302_s28 }
   0xc   :  { %51 = vmatpush.msra.mxu0 %v530_v5  ;;  %75 = vmatpush.msra.mxu1 %v530_v5  ;;  %v45_v17 = vld [vmem:[%s700_s0] sm:$0xff]  ;;  %v344_v21 = vld [vmem:[%s700_s0 + $0x8] sm:$0xff]  ;;  %v345_v25 = vld [vmem:[%s700_s0 + $0x10] sm:$0xff] }
   0xd   :  { %99 = vmatpush.msra.mxu2 %v530_v5  ;;  %123 = vmatpush.msra.mxu3 %v530_v5  ;;  %v346_v29 = vld [vmem:[%s700_s0 + $0x18] sm:$0xff]  ;;  %v202_v34 = vld [vmem:[%s702_s2 + $0x70] sm:$0xff]  ;;  %v201_v35 = vld [vmem:[%s702_s2 + $0x68] sm:$0xff] }
   0xe   :  { %52 = vmatpush.msra.mxu0 %v539_v6  ;;  %76 = vmatpush.msra.mxu1 %v539_v6  ;;  %v203_v33 = vld [vmem:[%s702_s2 + $0x78] sm:$0xff]  ;;  %v200_v36 = vld [vmem:[%s702_s2 + $0x60] sm:$0xff]  ;;  %v198_v38 = vld [vmem:[%s702_s2 + $0x50] sm:$0xff] }
   0xf   :  { %100 = vmatpush.msra.mxu2 %v539_v6  ;;  %124 = vmatpush.msra.mxu3 %v539_v6  ;;  %v199_v37 = vld [vmem:[%s702_s2 + $0x58] sm:$0xff]  ;;  %v197_v39 = vld [vmem:[%s702_s2 + $0x48] sm:$0xff]  ;;  %v196_v40 = vld [vmem:[%s702_s2 + $0x40] sm:$0xff] }
  0x10   :  { %53 = vmatpush.msra.mxu0 %v548_v7  ;;  %77 = vmatpush.msra.mxu1 %v548_v7  ;;  %v195_v41 = vld [vmem:[%s702_s2 + $0x38] sm:$0xff]  ;;  %v194_v42 = vld [vmem:[%s702_s2 + $0x30] sm:$0xff]  ;;  %v193_v43 = vld [vmem:[%s702_s2 + $0x28] sm:$0xff] }
  0x11   :  { %101 = vmatpush.msra.mxu2 %v548_v7  ;;  %125 = vmatpush.msra.mxu3 %v548_v7  ;;  %v347_v44 = vld [vmem:[%s700_s0 + $0x20] sm:$0xff]  ;;  %v191_v49 = vld [vmem:[%s702_s2 + $0x18] sm:$0xff]  ;;  %v190_v50 = vld [vmem:[%s702_s2 + $0x10] sm:$0xff] }
  0x12   :  { %54 = vmatpush.msra.mxu0 %v557_v8  ;;  %78 = vmatpush.msra.mxu1 %v557_v8  ;;  %v192_v48 = vld [vmem:[%s702_s2 + $0x20] sm:$0xff]  ;;  %v189_v51 = vld [vmem:[%s702_s2 + $0x8] sm:$0xff] }
  0x13   :  { %102 = vmatpush.msra.mxu2 %v557_v8  ;;  %126 = vmatpush.msra.mxu3 %v557_v8  ;;  %v188_v52 = vld [vmem:[%s702_s2] sm:$0xff]  ;;  %v348_v53 = vld [vmem:[%s700_s0 + $0x28] sm:$0xff] }
  0x14   :  { %55 = vmatpush.msra.mxu0 %v35_v9  ;;  %79 = vmatpush.msra.mxu1 %v35_v9  ;;  %v360_v57 = vld [vmem:[%s703_s3] ss:$0 sm:$0xff]  ;;  %v349_v59 = vld [vmem:[%s705_s5 + $0x8] sm:$0xff] }
  0x15   :  { %103 = vmatpush.msra.mxu2 %v35_v9  ;;  %127 = vmatpush.msra.mxu3 %v35_v9  ;;  %v230_v60 = vld [vmem:[%s704_s4] sm:$0xff]  ;;  %s440_s4 = smov [#allocation5]  }
  0x16   :  { %56 = vmatpush.msra.mxu0 %v34_v10  ;;  %80 = vmatpush.msra.mxu1 %v34_v10 }
  0x17   :  { %104 = vmatpush.msra.mxu2 %v34_v10  ;;  %128 = vmatpush.msra.mxu3 %v34_v10 }
  0x18   :  { %57 = vmatpush.msra.mxu0 %v33_v11  ;;  %81 = vmatpush.msra.mxu1 %v33_v11 }
  0x19   :  { %105 = vmatpush.msra.mxu2 %v33_v11  ;;  %129 = vmatpush.msra.mxu3 %v33_v11 }
  0x1a   :  { %58 = vmatpush.msra.mxu0 %v32_v12  ;;  %82 = vmatpush.msra.mxu1 %v32_v12 }
  0x1b   :  { %106 = vmatpush.msra.mxu2 %v32_v12  ;;  %130 = vmatpush.msra.mxu3 %v32_v12 }
  0x1c   :  { %59 = vmatpush.msra.mxu0 %v31_v13  ;;  %83 = vmatpush.msra.mxu1 %v31_v13 }
  0x1d   :  { %107 = vmatpush.msra.mxu2 %v31_v13  ;;  %131 = vmatpush.msra.mxu3 %v31_v13 }
  0x1e   :  { %60 = vmatpush.msra.mxu0 %v30_v14  ;;  %84 = vmatpush.msra.mxu1 %v30_v14 }
  0x1f   :  { %108 = vmatpush.msra.mxu2 %v30_v14  ;;  %132 = vmatpush.msra.mxu3 %v30_v14 }
  0x20   :  { %61 = vmatpush.msra.mxu0 %v29_v15  ;;  %85 = vmatpush.msra.mxu1 %v29_v15 }
  0x21   :  { %62 = vmatmul.f32.vlgmr.msra.gmra.mxu0 %v439_v16  ;;  %109 = vmatpush.msra.mxu2 %v29_v15 }
  0x22   :  { %133 = vmatpush.msra.mxu3 %v29_v15  ;;  %142 = vmatpush.msrb.mxu0 %v491_v0 }
  0x23   :  { %166 = vmatpush.msrb.mxu1 %v491_v0  ;;  %208 = vmatpush.msrb.mxu2 %v203_v33  ;;  %v350_v0 = vld [vmem:[%s705_s5 + $0x10] sm:$0xff] }
  0x24   :  { %143 = vmatpush.msrb.mxu0 %v496_v1 }
  0x25   :  { %167 = vmatpush.msrb.mxu1 %v496_v1  ;;  %209 = vmatpush.msrb.mxu2 %v202_v34  ;;  %v234_v1 = vld [vmem:[%s705_s5] sm:$0xff]  ;;  %s311_s5 = sshll.u32 %s440_s4, 4  ;;  %s312_s5 = int_to_ptr.vmem [resolvable:$true] %s311_s5 }
  0x26   :  { %144 = vmatpush.msrb.mxu0 %v503_v2 }
  0x27   :  { %168 = vmatpush.msrb.mxu1 %v503_v2  ;;  %210 = vmatpush.msrb.mxu2 %v201_v35 }
  0x28   :  { %145 = vmatpush.msrb.mxu0 %v512_v3 }
  0x29   :  { %169 = vmatpush.msrb.mxu1 %v512_v3  ;;  %211 = vmatpush.msrb.mxu2 %v200_v36 }
  0x2a   :  { %146 = vmatpush.msrb.mxu0 %v521_v4 }
  0x2b   :  { %170 = vmatpush.msrb.mxu1 %v521_v4  ;;  %212 = vmatpush.msrb.mxu2 %v199_v37 }
  0x2c   :  { %147 = vmatpush.msrb.mxu0 %v530_v5 }
  0x2d   :  { %171 = vmatpush.msrb.mxu1 %v530_v5  ;;  %213 = vmatpush.msrb.mxu2 %v198_v38 }
  0x2e   :  { %148 = vmatpush.msrb.mxu0 %v539_v6 }
  0x2f   :  { %172 = vmatpush.msrb.mxu1 %v539_v6  ;;  %214 = vmatpush.msrb.mxu2 %v197_v39 }
  0x30   :  { %149 = vmatpush.msrb.mxu0 %v548_v7 }
  0x31   :  { %173 = vmatpush.msrb.mxu1 %v548_v7  ;;  %215 = vmatpush.msrb.mxu2 %v196_v40 }
  0x32   :  { %150 = vmatpush.msrb.mxu0 %v557_v8 }
  0x33   :  { %174 = vmatpush.msrb.mxu1 %v557_v8  ;;  %216 = vmatpush.msrb.mxu2 %v195_v41 }
  0x34   :  { %151 = vmatpush.msrb.mxu0 %v35_v9 }
  0x35   :  { %175 = vmatpush.msrb.mxu1 %v35_v9  ;;  %217 = vmatpush.msrb.mxu2 %v194_v42 }
  0x36   :  { %152 = vmatpush.msrb.mxu0 %v34_v10 }
  0x37   :  { %176 = vmatpush.msrb.mxu1 %v34_v10  ;;  %218 = vmatpush.msrb.mxu2 %v193_v43 }
  0x38   :  { %153 = vmatpush.msrb.mxu0 %v33_v11 }
  0x39   :  { %177 = vmatpush.msrb.mxu1 %v33_v11  ;;  %219 = vmatpush.msrb.mxu2 %v192_v48 }
  0x3a   :  { %154 = vmatpush.msrb.mxu0 %v32_v12 }
  0x3b   :  { %178 = vmatpush.msrb.mxu1 %v32_v12  ;;  %220 = vmatpush.msrb.mxu2 %v191_v49 }
  0x3c   :  { %155 = vmatpush.msrb.mxu0 %v31_v13 }
  0x3d   :  { %179 = vmatpush.msrb.mxu1 %v31_v13  ;;  %221 = vmatpush.msrb.mxu2 %v190_v50 }
  0x3e   :  { %156 = vmatpush.msrb.mxu0 %v30_v14 }
  0x3f   :  { %180 = vmatpush.msrb.mxu1 %v30_v14  ;;  %222 = vmatpush.msrb.mxu2 %v189_v51 }
  0x40   :  { %157 = vmatpush.msrb.mxu0 %v29_v15 }
  0x41   :  { %181 = vmatpush.msrb.mxu1 %v29_v15  ;;  %223 = vmatpush.msrb.mxu2 %v188_v52 }
  0x9e   :  { %v63_v18 = vpop.f32.mrf.mxu0 }
  0x9f   :  { %v66_v19 = vadd.f32 %v63_v18, %v45_v17 }
  0xa1   :  { %361 = vtanh.f32 %v66_v19 }
  0xa7   :  { %v362_v20 = vpop.eup %361 }
  0xa8   :  { %86 = vmatmul.f32.vlgmr.msra.gmra.mxu1 %v362_v20 }
 0x125   :  { %v87_v22 = vpop.f32.mrf.mxu1 }
 0x126   :  { %v90_v23 = vadd.f32 %v344_v21, %v87_v22 }
 0x128   :  { %363 = vtanh.f32 %v90_v23 }
 0x12e   :  { %v364_v24 = vpop.eup %363 }
 0x12f   :  { %110 = vmatmul.f32.vlgmr.msra.gmra.mxu2 %v364_v24 }
 0x1b2   :  { %v111_v26 = vpop.f32.mrf.mxu2 }
 0x1b3   :  { %v114_v27 = vadd.f32 %v345_v25, %v111_v26 }
 0x1b5   :  { %365 = vtanh.f32 %v114_v27 }
 0x1bb   :  { %v366_v28 = vpop.eup %365 }
 0x1bc   :  { %134 = vmatmul.f32.vlgmr.msra.gmra.mxu3 %v366_v28 }
 0x23f   :  { %v135_v30 = vpop.f32.mrf.mxu3 }
 0x240   :  { %v138_v31 = vadd.f32 %v346_v29, %v135_v30 }
 0x242   :  { %367 = vtanh.f32 %v138_v31 }
 0x248   :  { %v368_v32 = vpop.eup %367 }
 0x249   :  { %158 = vmatmul.f32.vlgmr.msrb.gmra.mxu0 %v368_v32 }
 0x2c6   :  { %v159_v45 = vpop.f32.mrf.mxu0 }
 0x2c7   :  { %v162_v46 = vadd.f32 %v347_v44, %v159_v45 }
 0x2c9   :  { %369 = vtanh.f32 %v162_v46 }
 0x2cf   :  { %v370_v47 = vpop.eup %369 }
 0x2d0   :  { %182 = vmatmul.f32.vlgmr.msrb.gmra.mxu1 %v370_v47 }
 0x34d   :  { %v183_v54 = vpop.f32.mrf.mxu1 }
 0x34e   :  { %v186_v55 = vadd.f32 %v348_v53, %v183_v54 }
 0x350   :  { %371 = vtanh.f32 %v186_v55 }
 0x356   :  { %v372_v56 = vpop.eup %371 }
 0x357   :  { %228 = vst [vmem:[#allocation6] sm:$0xff] %v372_v56  ;;  %224 = vmatmul.f32.vlgmr.msrb.gmra.mxu2 %v372_v56 }
 0x358   :  { %327 = dma.vmem_to_hbm [thread:$0]  %s323_s23, 128, %s325_s26, [#allocation7]  }
 0x3da   :  { %v225_v58 = vpop.f32.mrf.mxu2 }
 0x3db   :  { %v226_v61 = vadd.f32 %v360_v57, %v225_v58 }
 0x3dd   :  { %229 = vst [vmem:[#allocation5] sm:$0xff] %v226_v61  ;;  %v243_v62 = vmul.f32 %v349_v59, %v226_v61  ;;  %v231_v63 = vmul.f32 %v230_v60, %v226_v61  ;;  %v252_v2 = vmul.f32 %v350_v0, %v226_v61  ;;  %v235_v3 = vmul.f32 %v234_v1, %v226_v61 }
 0x3de   :  { %316 = dma.vmem_to_hbm [thread:$0]  %s312_s5, 128, %s314_s21, [#allocation3]  }
 0x3df   :  { %244 = vadd.xlane.f32.xlu1 %v243_v62  ;;  %232 = vadd.xlane.f32.xlu0 %v231_v63 }
 0x3e7   :  { %253 = vadd.xlane.f32.xlu1 %v252_v2  ;;  %236 = vadd.xlane.f32.xlu0 %v235_v3 }
 0x452   :  { %v245_v4 = vpop.xlane.xlu1 %244  ;;  %v233_v5 = vpop.xlane.xlu0 %232 }
 0x453   :  { %v238_v6 = vsub.f32 1.0, %v233_v5 }
 0x455   :  { %v246_v7 = vadd.f32 %v245_v4, %v238_v6 }
 0x457   :  { %v247_v12 = vmax.f32 %v246_v7, 0.0 }
 0x45a   :  { %v254_v8 = vpop.xlane.xlu1 %253  ;;  %v237_v9 = vpop.xlane.xlu0 %236 }
 0x45b   :  { %v255_v10 = vadd.f32 %v254_v8, %v238_v6  ;;  %v239_v11 = vadd.f32 %v238_v6, %v237_v9  ;;  %v249_v14 = vmax.f32 %v237_v9, %v245_v4 }
 0x45d   :  { %v240_v13 = vmax.f32 %v239_v11, 0.0  ;;  %v256_v15 = vmax.f32 %v255_v10, 0.0  ;;  %v258_v18 = vmax.f32 %v249_v14, %v254_v8 }
 0x45f   :  { %v248_v17 = vadd.f32 %v247_v12, %v240_v13  ;;  %vm259_vm1 = vcmp.ge.f32.partialorder %v233_v5, %v258_v18 }
 0x460   :  { %v351_v21 = vsel %vm259_vm1, 1.0, %v439_v16 }
 0x461   :  { %v257_v19 = vadd.f32 %v256_v15, %v248_v17  ;;  %v285_v22 = vsel %vm271_vm0, %v351_v21, 0.0 }
 0x463   :  { %v272_v20 = vsel %vm271_vm0, %v257_v19, 0.0 }
 0x464   :  { %273 = vadd.xlane.f32.xlu2 %v272_v20 }
 0x46c   :  { %286 = vadd.xlane.f32.xlu2 %v285_v22 }
 0x4d7   :  { %v274_v16 = vpop.xlane.xlu2 %273 }
 0x4d8   :  { %v275_v23 = vrot.slane %v274_v16, 4 }
 0x4da   :  { %v276_v24 = vadd.f32 %v275_v23, %v274_v16 }
 0x4dc   :  { %v277_v25 = vrot.slane %v276_v24, 2 }
 0x4de   :  { %v278_v26 = vadd.f32 %v277_v25, %v276_v24 }
 0x4df   :  { %v287_v27 = vpop.xlane.xlu2 %286 }
 0x4e0   :  { %v288_v28 = vrot.slane %v287_v27, 4  ;;  %v279_v29 = vrot.slane %v278_v26, 1 }
 0x4e2   :  { %v289_v30 = vadd.f32 %v288_v28, %v287_v27  ;;  %v280_v31 = vadd.f32 %v279_v29, %v278_v26 }
 0x4e4   :  { %v290_v32 = vrot.slane %v289_v30, 2  ;;  %352 = vpush %v280_v31 }
 0x4e6   :  { %v291_v33 = vadd.f32 %v290_v32, %v289_v30 }
 0x4e8   :  { %v292_v34 = vrot.slane %v291_v33, 1 }
 0x4ea   :  { %v293_v35 = vadd.f32 %v292_v34, %v291_v33 }
 0x4ec   :  { %354 = vpush %v293_v35 }
 0x515   :  { %s353_s7 = spop %352 }
 0x516   :  { %283 = sst [smem:[#allocation2]] %s353_s7 }
 0x51d   :  { %s355_s29 = spop %354 }
 0x51e   :  { %296 = sst [smem:[#allocation2 + $0x1]] %s355_s29 }
 0x51f   :  { %305 = dma.smem_to_vmem %s442_s30, 16, %s303_s28, [#allocation4]  }
 0x520   :  { %433 = dma.done.wait [#allocation4], 16  }
 0x521   :  { %434 = vsyncadd [#allocation4], 4294967280 }
 0x522   :  { %435 = dma.done.wait [#allocation3], 128  }
 0x523   :  { %436 = vsyncadd [#allocation3], 4294967168 }
 0x524   :  { %437 = dma.done.wait [#allocation7], 128  }
 0x525   :  { %438 = vsyncadd [#allocation7], 4294967168 }
 0x526   :  { %340 = sfence }
 0x527   :  { %341 = vsyncpa [#allocation3], 1 }
 0x528   :  { %342 = vsyncpa [#allocation7], 1 }
 0x529   :  { %343 = vsyncpa [#allocation4], 1 }

</bundles_post_ra>
